<compile_context>
chip_gen: v6e
topology: v6e:2x2x1
jax: 0.10.0
libtpu: 0.0.40
codegen_flags: <defaults>
</compile_context>

<pallas_src>
import functools

import jax
import jax.numpy as jnp
from jax.experimental import pallas as pl
from jax.experimental.pallas import tpu as pltpu


def _round_up(x, m):
    return ((x + m - 1) // m) * m


def _dice_conf_kernel(pred_ref, label_ref, out_ref, *, num_classes,
                      total_pixels, tile, tiles_per_split, apply_argmax,
                      masked_tail):
    """Accumulate an extended per-class confusion matrix for one pixel tile.

    pred_ref : (C, tile) or (1, tile)  predictions, native dtype
    label_ref: (1, tile)               integer labels, native narrow dtype
    out_ref  : (rows_pad, lane_pad) int32 resident accumulator:
               out_ref[i, j] (j < C): # pixels with pred == i and label == j
               out_ref[i, C]        : # pixels with pred == i (any label)
    """
    t = pl.program_id(2)
    C = num_classes

    @pl.when(t == 0)
    def _init():
        out_ref[...] = jnp.zeros_like(out_ref)

    pred = pred_ref[...]
    label = label_ref[...].astype(jnp.int32)                 # (1, tile)

    class_ids = jax.lax.broadcasted_iota(jnp.int32, (C, tile), 0)

    if apply_argmax:
        # First-max-wins argmax over the class (sublane) axis: XLU max, then
        # the minimum class index among maximal rows (matches jnp/torch argmax
        # for non-NaN logits).
        best = jnp.max(pred, axis=0, keepdims=True)           # (1, tile) XLU
        cand = jnp.where(pred == best, class_ids, jnp.int32(C))
        arg = jnp.min(cand, axis=0, keepdims=True)            # (1, tile) XLU
    else:
        arg = (pred > 0.5).astype(jnp.int32)                  # (1, tile)

    if masked_tail:
        # Padded / out-of-range lanes predict class -1 -> all-zero one-hot
        # column -> contribute nothing (so label-pad garbage is irrelevant).
        g = pl.program_id(1) * tiles_per_split + t
        lane = jax.lax.broadcasted_iota(jnp.int32, (1, tile), 1)
        arg = jnp.where(g * tile + lane < total_pixels, arg, jnp.int32(-1))

    pred_oh = (class_ids == arg).astype(jnp.bfloat16)         # (C, tile)

    # Label one-hot extended with an all-ones row (row C) so the same matmul
    # also yields per-class prediction counts; robust to labels outside [0,C).
    ext_ids = jax.lax.broadcasted_iota(jnp.int32, (C + 1, tile), 0)
    rhs = jnp.logical_or(ext_ids == label,
                         ext_ids == jnp.int32(C)).astype(jnp.bfloat16)

    conf = jax.lax.dot_general(pred_oh, rhs, (((1,), (1,)), ((), ())),
                               preferred_element_type=jnp.float32)  # (C, C+1)
    out_ref[0:C, 0:C + 1] += conf.astype(jnp.int32)


def _vmem_budget_and_limit():
    """Generation-aware VMEM budgets (v7x: 64 MiB; v5e/v6e: 128 MiB)."""
    try:
        cap = int(pltpu.get_tpu_info().vmem_capacity_bytes)
    except Exception:
        cap = 64 * 1024 * 1024            # conservative (v7x-sized) fallback
    budget = max(8 << 20, min(cap // 4, 32 << 20))
    limit = max(32 << 20, min(cap // 2, 96 << 20))
    return budget, limit


def _pick_tile(total_pixels, streamed_channels, pred_itemsize, lbl_itemsize,
               num_classes, vmem_budget, max_tile):
    """Largest 128-multiple pixel tile fitting a conservative VMEM budget."""
    # Per-lane bytes: double-buffered pred + label input blocks plus headroom
    # for the live (C, tile)-ish temporaries (iotas, candidates, one-hots).
    per_lane = (2 * streamed_channels * pred_itemsize + 2 * lbl_itemsize
                + 8 * num_classes * 4 + 64)
    tile = vmem_budget // max(per_lane, 1)
    tile = min(tile, max_tile)
    tile = min(tile, _round_up(total_pixels, 128))
    tile = max(128, (tile // 128) * 128)
    return int(tile)


def dice_coefficient(predictions, targets, *, bg=False, nan_score=0.0,
                     no_fg_score=0.0, apply_argmax=True, _max_tile=32768):
    """Equivalent of DiceCoefficient.forward(predictions, targets)."""
    # TODO(synk): the reference's logger.warning on all-zero predictions and
    # the cls_logging side effects are not reproduced (value is unaffected).
    N = predictions.shape[0]
    C = predictions.shape[1]
    S = 1
    for d in predictions.shape[2:]:
        S *= int(d)

    pred3d = predictions.reshape(N, C, S)             # free reshape, no copy
    if targets.dtype.name not in ("int8", "uint8", "int16", "int32"):
        targets = targets.astype(jnp.int32)
    label3d = targets.reshape(N, 1, S)                # streamed in native dtype

    Ck = C if apply_argmax else 1                     # channels actually read
    budget, vmem_limit = _vmem_budget_and_limit()
    tile = _pick_tile(S, Ck, pred3d.dtype.itemsize, label3d.dtype.itemsize,
                      C, budget, _max_tile)

    num_tiles = (S + tile - 1) // tile
    # v7x has two TensorCores; when there is no batch parallelism, split the
    # pixel tiles across a second "parallel" grid axis instead.
    n_splits = 2 if (N == 1 and num_tiles >= 2) else 1
    tiles_per_split = (num_tiles + n_splits - 1) // n_splits
    masked_tail = (n_splits * tiles_per_split * tile) != S
    needs_clamp = n_splits * tiles_per_split > num_tiles

    rows_pad = _round_up(C, 8)
    lane_pad = max(128, _round_up(C + 1, 128))

    def pix_map(n, s, t):
        g = s * tiles_per_split + t
        if needs_clamp:                         # fully out-of-range blocks just
            g = jnp.minimum(g, num_tiles - 1)   # re-read the last tile; the
        return (n, 0, g)                        # kernel masks them to zero.

    kernel = functools.partial(
        _dice_conf_kernel, num_classes=C, total_pixels=S, tile=tile,
        tiles_per_split=tiles_per_split, apply_argmax=apply_argmax,
        masked_tail=masked_tail)

    stats = pl.pallas_call(
        kernel,
        out_shape=jax.ShapeDtypeStruct((N, n_splits, rows_pad, lane_pad),
                                       jnp.int32),
        grid=(N, n_splits, tiles_per_split),
        in_specs=[
            pl.BlockSpec((None, Ck, tile), pix_map),
            pl.BlockSpec((None, 1, tile), pix_map),
        ],
        out_specs=pl.BlockSpec((None, None, rows_pad, lane_pad),
                               lambda n, s, t: (n, s, 0, 0)),
        compiler_params=pltpu.CompilerParams(
            dimension_semantics=("parallel", "parallel", "arbitrary"),
            vmem_limit_bytes=vmem_limit),
    )(pred3d, label3d)

    # Tiny final reduction + per-class dice math; counts stay int32 until the
    # final division (exact for < 2^31 pixels per class).
    conf = jnp.sum(stats, axis=(0, 1))[0:C, 0:C + 1]        # (C, C+1) int32
    tp = jnp.diagonal(conf[:, 0:C])
    pred_cnt = conf[:, C]
    lbl_cnt = jnp.sum(conf[:, 0:C], axis=0)
    fp = pred_cnt - tp
    fn = lbl_cnt - tp

    start = 1 - int(bool(bg))
    tp, fp, fn, lbl_cnt = tp[start:], fp[start:], fn[start:], lbl_cnt[start:]

    denom = 2 * tp + fp + fn                                  # int32
    raw = (2.0 * tp.astype(jnp.float32)) / jnp.where(
        denom == 0, jnp.float32(1.0), denom.astype(jnp.float32))
    score_cls = jnp.where(lbl_cnt == 0, jnp.float32(no_fg_score),
                          jnp.where(denom == 0, jnp.float32(nan_score), raw))
    return jnp.sum(score_cls) / (C - start)


def _dice_reference(predictions, targets, *, bg=False, nan_score=0.0,
                    no_fg_score=0.0, apply_argmax=True):
    """Pure-JAX reference matching the PyTorch dice_score semantics."""
    C = predictions.shape[1]
    if apply_argmax:
        cls_pred = jnp.argmax(predictions, axis=1)
    else:
        cls_pred = (predictions[:, 0] > 0.5).astype(jnp.int32)
    label = targets
    start = 1 - int(bool(bg))
    score = jnp.float32(0.0)
    for i in range(start, C):
        tp = jnp.sum((cls_pred == i) & (label == i)).astype(jnp.float32)
        fp = jnp.sum((cls_pred == i) & (label != i)).astype(jnp.float32)
        fn = jnp.sum((cls_pred != i) & (label == i)).astype(jnp.float32)
        denom = 2.0 * tp + fp + fn
        raw = (2.0 * tp) / jnp.where(denom == 0.0, 1.0, denom)
        has_fg = jnp.sum(label == i) > 0
        score_cls = jnp.where(has_fg,
                              jnp.where(denom == 0.0, jnp.float32(nan_score), raw),
                              jnp.float32(no_fg_score))
        score = score + score_cls
    return score / (C - start)


if __name__ == "__main__":
    key = jax.random.PRNGKey(0)
    kp, kl = jax.random.split(key)

    N, C, H, W = 2, 4, 16, 16
    predictions = jax.random.normal(kp, (N, C, H, W), dtype=jnp.float32)
    targets = jax.random.randint(kl, (N, H, W), 0, C, dtype=jnp.int32)

    score = jax.block_until_ready(dice_coefficient(predictions, targets))
    ref = _dice_reference(predictions, targets)
    assert jnp.allclose(score, ref, atol=1e-5), (score, ref)

    # Narrow (uint8) label streaming path.
    s_u8 = jax.block_until_ready(
        dice_coefficient(predictions, targets.astype(jnp.uint8)))
    assert jnp.allclose(s_u8, ref, atol=1e-5), (s_u8, ref)

    # Tail-masking path: pixel count not a multiple of the 128-lane tiling.
    k3, k4 = jax.random.split(kl)
    H2, W2 = 13, 11
    p2 = jax.random.normal(k3, (N, C, H2, W2), dtype=jnp.float32)
    t2 = jax.random.randint(k4, (N, H2, W2), 0, C, dtype=jnp.int32)
    s2 = jax.block_until_ready(dice_coefficient(p2, t2))
    r2 = _dice_reference(p2, t2)
    assert jnp.allclose(s2, r2, atol=1e-5), (s2, r2)

    # Thresholded (apply_argmax=False) path: only channel 0 is streamed.
    probs = jax.nn.softmax(p2, axis=1)
    s3 = jax.block_until_ready(dice_coefficient(probs, t2, apply_argmax=False))
    r3 = _dice_reference(probs, t2, apply_argmax=False)
    assert jnp.allclose(s3, r3, atol=1e-5), (s3, r3)

    # Single-image path: exercises the tile-split ("two cores") grid axis, the
    # clamped index map for an odd tile count, and bg=True.
    k5, k6 = jax.random.split(k4)
    p4 = jax.random.normal(k5, (1, 3, 15, 20), dtype=jnp.float32)
    t4 = jax.random.randint(k6, (1, 15, 20), 0, 3, dtype=jnp.int32)
    s4 = jax.block_until_ready(
        dice_coefficient(p4, t4, bg=True, _max_tile=128))
    r4 = _dice_reference(p4, t4, bg=True)
    assert jnp.allclose(s4, r4, atol=1e-5), (s4, r4)

    print("KERNEL_OK")
</pallas_src>

<mosaic_0001>
module attributes {stable_mosaic.version = 11 : i64} {
  func.func @_dice_conf_kernel(%arg0: i32, %arg1: i32, %arg2: i32, %arg3: memref<1x4x256xf32, #tpu.memory_space<vmem>>, %arg4: memref<1x1x256xi32, #tpu.memory_space<vmem>>, %arg5: memref<1x1x8x128xi32, #tpu.memory_space<vmem>>) attributes {dimension_semantics = [#tpu.dimension_semantics<parallel>, #tpu.dimension_semantics<parallel>, #tpu.dimension_semantics<arbitrary>], iteration_bounds = array<i64: 2, 1, 1>, scalar_prefetch = 0 : i64, scratch_operands = 0 : i64, tpu.core_type = #tpu.core_type<tc>, window_params = [{transform_indices = @transform_0, window_bounds = array<i64: 1, 4, 256>}, {transform_indices = @transform_1, window_bounds = array<i64: 1, 1, 256>}, {transform_indices = @transform_2, window_bounds = array<i64: 1, 1, 8, 128>}]} {
    %c0_i32 = arith.constant 0 : i32
    %0 = arith.cmpi eq, %arg2, %c0_i32 : i32
    %1 = arith.extui %0 : i1 to i32
    %c0_i32_0 = arith.constant 0 : i32
    %2 = arith.cmpi ne, %1, %c0_i32_0 : i32
    scf.if %2 {
      %c0_i32_17 = arith.constant 0 : i32
      %38 = vector.broadcast %c0_i32_17 : i32 to vector<8x128xi32>
      %c0_18 = arith.constant 0 : index
      %c0_19 = arith.constant 0 : index
      %c0_20 = arith.constant 0 : index
      %c0_21 = arith.constant 0 : index
      %39 = vector.load %arg5[%c0_18, %c0_19, %c0_20, %c0_21] : memref<1x1x8x128xi32, #tpu.memory_space<vmem>>, vector<1x1x8x128xi32>
      %40 = vector.shape_cast %39 : vector<1x1x8x128xi32> to vector<8x128xi32>
      %41 = vector.shape_cast %38 : vector<8x128xi32> to vector<1x1x8x128xi32>
      tpu.vector_store %arg5[%c0_18, %c0_19, %c0_20, %c0_21], %41 {strides = array<i32>} : memref<1x1x8x128xi32, #tpu.memory_space<vmem>>, vector<1x1x8x128xi32>,
    } else {
    }
    %c0 = arith.constant 0 : index
    %c0_1 = arith.constant 0 : index
    %c0_2 = arith.constant 0 : index
    %3 = vector.load %arg3[%c0, %c0_1, %c0_2] : memref<1x4x256xf32, #tpu.memory_space<vmem>>, vector<1x4x256xf32>
    %4 = vector.shape_cast %3 : vector<1x4x256xf32> to vector<4x256xf32>
    %c0_3 = arith.constant 0 : index
    %c0_4 = arith.constant 0 : index
    %c0_5 = arith.constant 0 : index
    %5 = vector.load %arg4[%c0_3, %c0_4, %c0_5] : memref<1x1x256xi32, #tpu.memory_space<vmem>>, vector<1x1x256xi32>
    %6 = vector.shape_cast %5 : vector<1x1x256xi32> to vector<1x256xi32>
    %7 = tpu.iota {dimensions = array<i32: 0>} : vector<4x256xi32>
    %cst = arith.constant dense<0xFF800000> : vector<256xf32>
    %8 = vector.multi_reduction <maximumf>, %4, %cst [0] : vector<4x256xf32> to vector<256xf32>
    %9 = vector.shape_cast %8 : vector<256xf32> to vector<1x256xf32>
    %10 = vector.broadcast %9 : vector<1x256xf32> to vector<4x256xf32>
    %11 = arith.cmpf oeq, %4, %10 : vector<4x256xf32>
    %c4_i32 = arith.constant 4 : i32
    %12 = vector.broadcast %c4_i32 : i32 to vector<4x256xi32>
    %13 = arith.select %11, %7, %12 : vector<4x256xi1>, vector<4x256xi32>
    %cst_6 = arith.constant dense<2147483647> : vector<256xi32>
    %14 = vector.multi_reduction <minsi>, %13, %cst_6 [0] : vector<4x256xi32> to vector<256xi32>
    %15 = vector.shape_cast %14 : vector<256xi32> to vector<1x256xi32>
    %16 = vector.broadcast %15 : vector<1x256xi32> to vector<4x256xi32>
    %17 = arith.cmpi eq, %7, %16 : vector<4x256xi32>
    %18 = arith.extui %17 : vector<4x256xi1> to vector<4x256xi32>
    %19 = arith.sitofp %18 : vector<4x256xi32> to vector<4x256xf32>
    %20 = arith.truncf %19 : vector<4x256xf32> to vector<4x256xbf16>
    %21 = tpu.iota {dimensions = array<i32: 0>} : vector<5x256xi32>
    %22 = vector.broadcast %6 : vector<1x256xi32> to vector<5x256xi32>
    %23 = arith.cmpi eq, %21, %22 : vector<5x256xi32>
    %c4_i32_7 = arith.constant 4 : i32
    %24 = vector.broadcast %c4_i32_7 : i32 to vector<5x256xi32>
    %25 = arith.cmpi eq, %21, %24 : vector<5x256xi32>
    %26 = arith.ori %23, %25 : vector<5x256xi1>
    %27 = arith.extui %26 : vector<5x256xi1> to vector<5x256xi32>
    %28 = arith.sitofp %27 : vector<5x256xi32> to vector<5x256xf32>
    %29 = arith.truncf %28 : vector<5x256xf32> to vector<5x256xbf16>
    %cst_8 = arith.constant dense<0.000000e+00> : vector<4x5xf32>
    %30 = tpu.matmul %20, %29, %cst_8 {dimension_numbers = #tpu.dot_dimension_numbers<[1], [1], [0], [0], [0, 0, 1, 0], [], []>} : vector<4x256xbf16>, vector<5x256xbf16>, vector<4x5xf32> -> vector<4x5xf32>
    %c0_9 = arith.constant 0 : index
    %c0_10 = arith.constant 0 : index
    %c0_11 = arith.constant 0 : index
    %c0_12 = arith.constant 0 : index
    %31 = vector.load %arg5[%c0_9, %c0_10, %c0_11, %c0_12] : memref<1x1x8x128xi32, #tpu.memory_space<vmem>>, vector<1x1x4x5xi32>
    %32 = vector.shape_cast %31 : vector<1x1x4x5xi32> to vector<4x5xi32>
    %33 = arith.fptosi %30 : vector<4x5xf32> to vector<4x5xi32>
    %34 = arith.addi %32, %33 : vector<4x5xi32>
    %c0_13 = arith.constant 0 : index
    %c0_14 = arith.constant 0 : index
    %c0_15 = arith.constant 0 : index
    %c0_16 = arith.constant 0 : index
    %35 = vector.load %arg5[%c0_13, %c0_14, %c0_15, %c0_16] : memref<1x1x8x128xi32, #tpu.memory_space<vmem>>, vector<1x1x4x5xi32>
    %36 = vector.shape_cast %35 : vector<1x1x4x5xi32> to vector<4x5xi32>
    %37 = vector.shape_cast %34 : vector<4x5xi32> to vector<1x1x4x5xi32>
    tpu.vector_store %arg5[%c0_13, %c0_14, %c0_15, %c0_16], %37 {strides = array<i32>} : memref<1x1x8x128xi32, #tpu.memory_space<vmem>>, vector<1x1x4x5xi32>,
    return
  }
  func.func @transform_0(%arg0: i32, %arg1: i32, %arg2: i32) -> (i32, i32, i32) {
    %c1_i32 = arith.constant 1 : i32
    %0 = arith.muli %arg1, %c1_i32 : i32
    %1 = arith.addi %0, %arg2 : i32
    %c0_i32 = arith.constant 0 : i32
    %c0_i32_0 = arith.constant 0 : i32
    return %arg0, %c0_i32, %1 : i32, i32, i32
  }
  func.func @transform_1(%arg0: i32, %arg1: i32, %arg2: i32) -> (i32, i32, i32) {
    %c1_i32 = arith.constant 1 : i32
    %0 = arith.muli %arg1, %c1_i32 : i32
    %1 = arith.addi %0, %arg2 : i32
    %c0_i32 = arith.constant 0 : i32
    %c0_i32_0 = arith.constant 0 : i32
    return %arg0, %c0_i32, %1 : i32, i32, i32
  }
  func.func @transform_2(%arg0: i32, %arg1: i32, %arg2: i32) -> (i32, i32, i32, i32) {
    %c0_i32 = arith.constant 0 : i32
    %c0_i32_0 = arith.constant 0 : i32
    %c0_i32_1 = arith.constant 0 : i32
    return %arg0, %arg1, %c0_i32, %c0_i32_0 : i32, i32, i32, i32
  }
}

</mosaic_0001>

<bundles_post_ra>
// kernel: tpu_custom_call.1
= control target key start
LH: loop header
LB: loop body
LE: loop exit
PB: predicated region body
PF: predicated region fallthrough
CT: control target
= control target key end

     0   :  { %7 = vsyncpa [#allocation3], 0  ;;  %s962_s0 = inlined_call_operand.hbm [shape: f32[2,4,256], index: 0, kind: input, shape index: {}]   ;;  %s963_s1 = inlined_call_operand.hbm [shape: s32[2,1,256], index: 1, kind: input, shape index: {}]   ;;  %s964_s2 = inlined_call_operand.hbm [shape: s32[2,1,8,128], index: 2, kind: output, shape index: {}]  }
   0x1   :  { %9 = vsyncpa [#allocation3 + $0x1], 0 }
   0x2   :  { %10 = vsyncpa [#allocation6], 0 }
   0x3   :  { %12 = vsyncpa [#allocation6 + $0x1], 0 }
   0x4   :  { %13 = vsyncpa [#allocation4], 0 }
   0x5   :  { %15 = vsyncpa [#allocation4 + $0x1], 0  ;;  %s767_s9 = smov 0   ;;  %s769_s10 = smov 0  }
   0x6   :  { %s771_s11 = smov 0   ;;  %s773_s12 = smov 0  }
   0x7   :  { %s775_s13 = smov 0   ;;  %s777_s14 = smov 0  }
   0x8 LB: > { %s499_s15 = sadd.s32 4294967295, %s744_s14   ;;  %s500_s16 = sadd.s32 4294967294, %s744_s14   ;;  %s744_s14 = sphi %s777_s14, %s21_s14   ;;  %s740_s13 = sphi %s775_s13, %s976_s13   ;;  %s736_s12 = sphi %s773_s12, %s975_s12   ;;  %s732_s11 = sphi %s771_s11, %s974_s11   ;;  %s728_s10 = sphi %s769_s10, %s973_s10   ;;  %s724_s9 = sphi %s767_s9, %s972_s9  }
   0x9   : > { %s40_s17 = sadd.s32 1, %s740_s13  ;;  %s51_s18 = sadd.s32 1, %s732_s11 }
   0xa   : > { %p42_p0 = scmp.ge.s32.totalorder %s40_s17, 2  ;;  %p58_p1 = scmp.ne.s32.totalorder %s732_s11, %s728_s10 }
   0xb   : > { %p59_p2 = scmp.eq.s32.totalorder %s744_s14, 0  ;;  %p64_p3 = scmp.ne.s32.totalorder %s728_s10, %s724_s9 }
   0xc   : > { %s978_s17 = smov (%p42_p0, %s40_s17), 0  ;;  %p65_p5 = scmp.eq.s32.totalorder %s499_s15, 0 }
   0xd   : > { %p808_p4 = por %p59_p2, %p58_p1  ;;  %s46_s20 = ssub.s32 %s740_s13, %s978_s17 }
   0xe   : > { %p120_p6 = scmp.eq.s32.totalorder %s499_s15, 1  ;;  %p49_p7 = scmp.eq.s32.totalorder %s46_s20, 0 }
   0xf   : > { %p814_p8 = por %p65_p5, %p64_p3  ;;  %p126_p10 = scmp.eq.s32.totalorder %s500_s16, 1 }
  0x10   : > { %p818_p9 = por %p120_p6, %p58_p1  ;;  %p550_p13 = scmp.lt.s32.totalorder %s744_s14, 2 }
  0x11   : > { %s823_s23 = scalar_select %p49_p7, %s732_s11, %s51_s18  }
  0x12   : > { %p825_p11 = por %p126_p10, %p64_p3  ;;  %s832_s25 = sand.u32 1, %s732_s11  }
  0x13   : > { %s503_s26 = sshll.u32 %s832_s25, 3  ;;  %s529_s27 = sshll.u32 %s740_s13, 7 }
  0x14   : > { %s159_s30 = scalar_lea.hbm %s962_s0, %s529_s27  ;;  %s150_s3 = scalar_lea.vmem [#allocation2], %s503_s26 }
  0x15   : > { %s161_s4 = sshll.u32 %s150_s3, 4  ;;  %p841_p0 = pnand %p550_p13, %p808_p4  ;;  %s162_s4 = int_to_ptr.vmem [resolvable:$true] %s161_s4 }
  0x16   : > { %p509_p1 = scmp.ge.s32.totalorder %s744_s14, 1  ;;  %p188_p2 = scmp.lt.s32.totalorder %s744_s14, 3 }
  0x17   : > { %s147_s6 = scalar_lea.sflag [#allocation3], %s832_s25  ;;  %p606_p3 = pneg %p841_p0 }
  0x18   : > { %s617_s7 = scalar_lea.vmem %s162_s4, 128  ;;  %s746_s8 = smov [#allocation2]  }
  0x19   : > { %p618_p5 = scmp.ne.s32.totalorder %s162_s4, %s617_s7  ;;  %s622_s15 = sshll.u32 %s746_s8, 4  ;;  %s623_s15 = int_to_ptr.vmem [resolvable:$false] %s622_s15 }
  0x1a   : > { %s624_s16 = scalar_lea.vmem %s623_s15, 256  ;;  %p625_p4 = scmp.lt.s32.totalorder %s162_s4, %s623_s15 }
  0x1b   : > { %p620_p6 = pnand %p618_p5, %p606_p3  ;;  %p626_p10 = scmp.lt.s32.totalorder %s624_s16, %s617_s7 }
  0x1d   : > { %p621_p7 = pneg %p620_p6  ;;  %p627_p13 = por %p626_p10, %p625_p4 }
  0x1f   : > { %p628_p12 = pnand %p627_p13, %p621_p7 }
  0x21   : > { %631 = shalt.err (!%p628_p12)
}
  0x22   : > { %542 = dma.hbm_to_vmem [thread:$0]  (!%p841_p0), %s159_s30, 128, %s162_s4, %s147_s6  }
  0x23   : > { %p859_p5 = pnand %p509_p1, %p188_p2  ;;  %s506_s19 = sshll.u32 %s832_s25, 1 }
  0x24   : > { %s530_s20 = sshll.u32 %s740_s13, 5  ;;  %s172_s29 = scalar_lea.vmem [#allocation5], %s506_s19 }
  0x25   : > { %s181_s28 = scalar_lea.hbm %s963_s1, %s530_s20  ;;  %s183_s3 = sshll.u32 %s172_s29, 4  ;;  %s184_s3 = int_to_ptr.vmem [resolvable:$true] %s183_s3 }
  0x26   : > { %s169_s7 = scalar_lea.sflag [#allocation6], %s832_s25  ;;  %s645_s8 = scalar_lea.vmem %s184_s3, 32 }
  0x27   : > { %p646_p12 = scmp.ne.s32.totalorder %s184_s3, %s645_s8  ;;  %s747_s30 = smov [#allocation5]  }
  0x28   : > { %s650_s4 = sshll.u32 %s747_s30, 4  ;;  %s651_s4 = int_to_ptr.vmem [resolvable:$false] %s650_s4 }
  0x29   : > { %p648_p6 = pnand %p646_p12, %p606_p3  ;;  %s652_s6 = scalar_lea.vmem %s651_s4, 64 }
  0x2a   : > { %p653_p1 = scmp.lt.s32.totalorder %s184_s3, %s651_s4  ;;  %p654_p2 = scmp.lt.s32.totalorder %s652_s6, %s645_s8 }
  0x2b   : > { %p649_p7 = pneg %p648_p6 }
  0x2c   : > { %p655_p4 = por %p654_p2, %p653_p1 }
  0x2e   : > { %p656_p10 = pnand %p655_p4, %p649_p7 }
  0x30   : > { %659 = shalt.err (!%p656_p10)
}
  0x31   : > { %545 = dma.hbm_to_vmem [thread:$0]  (!%p841_p0), %s181_s28, 32, %s184_s3, %s169_s7  }
  0x32   : > { %192 = sbr.rel (%p859_p5) target bundleno = 310 (0x136), region = 28  ;;  %s877_s25 = sand.u32 (!%p859_p5), 1, %s728_s10  }
  0x33   : > { %s510_s15 = sshll.u32 (!%p859_p5), %s877_s25, 3  ;;  %s195_s16 = scalar_lea.sflag (!%p859_p5), [#allocation3], %s877_s25 }
  0x34   : > { %s198_s19 = scalar_lea.vmem (!%p859_p5), [#allocation2], %s510_s15 }
  0x37   : > { %711 = dma.done.wait (%p814_p8), %s195_s16, 128  }
  0x38   : > { %713 = vsyncadd (%p814_p8), %s195_s16, 4294967168  ;;  %s511_s5 = sshll.u32 %s877_s25, 1  ;;  %s204_s18 = scalar_lea.sflag [#allocation6], %s877_s25 }
  0x39   : > { %s207_s20 = scalar_lea.vmem [#allocation5], %s511_s5 }
  0x3a   : > { %715 = dma.done.wait (%p814_p8), %s204_s18, 32  }
  0x3b   : > { %717 = vsyncadd (%p814_p8), %s204_s18, 4294967264  ;;  %v245_v0 = vlaneseq  ;;  %s893_s26 = scalar_lea.vmem [#allocation7], %s510_s15  ;;  %v748_v2 = vmov 0   ;;  %vm250_vm0 = vcmask 1043456   ;;  %v244_v5 = vld [vmem:[%s207_s20] sm:$0x3] }
  0x3c   : > { %242 = vst [vmem:[%s893_s26] sm:$0xff] %v748_v2  ;;  %v243_v6 = vld [vmem:[%s198_s19] sm:$0xff]  ;;  %v749_v13 = vmov 839922192   ;;  %v750_v17 = vmov 1.0|1.0   ;;  %s526_s21 = sshll.u32 %s736_s12, 7 }
  0x3d   : > { %v891_v1 = vshrl.u32 %v245_v0, 7  ;;  %v248_v9 = vcombine.high %v243_v6, %v243_v6  ;;  %v251_v10 = vsel %vm250_vm0, %v243_v6, -inf  ;;  %v271_v14 = vunpack.c.l.s4 %v749_v13  ;;  %s386_s27 = sshll.u32 %s893_s26, 4  ;;  %s919_s3 = scalar_lea.hbm %s964_s2, %s526_s21  ;;  %s387_s27 = int_to_ptr.vmem [resolvable:$true] %s386_s27 }
  0x3e   : > { %v252_v11 = vrot.slane %v251_v10, 4  ;;  %s372_s7 = scalar_lea.sflag [#allocation4], %s877_s25  ;;  %s660_s8 = scalar_lea.vmem %s387_s27, 128 }
  0x3f   : > { %v313_v3 = vsub.s32 1, %v891_v1  ;;  %v309_v4 = vsub.s32 0, %v891_v1  ;;  %vm317_vm1 = vcmp.eq.s32.totalorder %v891_v1, 4  ;;  %v258_v12 = vsel %vm250_vm0, %v248_v9, -inf  ;;  %p661_p8 = scmp.ne.s32.totalorder %s387_s27, %s660_s8  ;;  %s751_s12 = smov [#allocation7]  }
  0x40   : > { %v253_v15 = vmax.f32 %v251_v10, %v252_v11  ;;  %v259_v16 = vrot.slane %v258_v12, 4  ;;  %v272_v20 = vunpack.c.0.s8 %v271_v14  ;;  %s664_s30 = sshll.u32 %s751_s12, 4  ;;  %s665_s30 = int_to_ptr.vmem [resolvable:$false] %s664_s30 }
  0x41   : > { %v314_v7 = vrot.slane %v244_v5, %v313_v3  ;;  %v310_v8 = vrot.slane %v244_v5, %v309_v4  ;;  %p662_p0 = pnand %p661_p8, %p818_p9  ;;  %s666_s4 = scalar_lea.vmem %s665_s30, 256 }
  0x42   : > { %v254_v18 = vrot.slane %v253_v15, 2  ;;  %v260_v19 = vmax.f32 %v258_v12, %v259_v16  ;;  %v275_v25 = vsub.s32 %v272_v20, %v891_v1  ;;  %p667_p13 = scmp.lt.s32.totalorder %s387_s27, %s665_s30  ;;  %p668_p5 = scmp.lt.s32.totalorder %s666_s4, %s660_s8 }
  0x43   : > { %vm316_vm2 = vcmp.eq.s32.totalorder %v891_v1, %v314_v7  ;;  %vm315_vm3 = vcmp.eq.s32.totalorder %v891_v1, %v310_v8  ;;  %v366_v49 = vld [vmem:[%s893_s26] sm:$0xf]  ;;  %p663_p3 = pneg %p662_p0 }
  0x44   : > { %vm319_vm4 = vmor %vm316_vm2, %vm317_vm1  ;;  %v255_v21 = vmax.f32 %v253_v15, %v254_v18  ;;  %v261_v22 = vrot.slane %v260_v19, 2  ;;  %v276_v29 = vrot.slane %v891_v1, %v275_v25  ;;  %p669_p12 = por %p668_p5, %p667_p13 }
  0x45   : > { %vm517_vm5 = vmpackc.low %vm319_vm4, %vm319_vm4 }
  0x46   : > { %518 = vmatprep.subr.msk.bf16.mxu0 %vm517_vm5, %v750_v17  ;;  %vm318_vm6 = vmor %vm315_vm3, %vm317_vm1  ;;  %v256_v23 = vrot.slane %v255_v21, 1  ;;  %v262_v24 = vmax.f32 %v260_v19, %v261_v22  ;;  %vm369_vm3 = vcmask 35840   ;;  %p670_p6 = pnand %p669_p12, %p663_p3 }
  0x47   : > { %vm519_vm7 = vmpackc.low %vm318_vm6, %vm318_vm6 }
  0x48   : > { %520 = vmatpush1.bf16.xpose.msk.msra.mxu0 %vm519_vm7, %v750_v17  ;;  %v257_v26 = vmax.f32 %v255_v21, %v256_v23  ;;  %v263_v27 = vrot.slane %v262_v24, 1 }
  0x4a   : > { %v264_v28 = vmax.f32 %v262_v24, %v263_v27 }
  0x4c   : > { %v267_v30 = vcombine.low %v257_v26, %v264_v28 }
  0x4e   : > { %vm269_vm8 = vcmp.eq.f32.partialorder %v243_v6, %v267_v30 }
  0x4f   : > { %v277_v31 = vsel %vm269_vm8, %v276_v29, 4 }
  0x50   : > { %v278_v32 = vcombine.high %v277_v31, %v277_v31  ;;  %v279_v33 = vsel %vm250_vm0, %v277_v31, 2147483647 }
  0x51   : > { %v280_v34 = vrot.slane %v279_v33, 4 }
  0x52   : > { %v289_v35 = vsel %vm250_vm0, %v278_v32, 2147483647 }
  0x53   : > { %v290_v36 = vrot.slane %v289_v35, 4  ;;  %vm281_vm9 = vcmp.lt.s32.totalorder %v279_v33, %v280_v34 }
  0x54   : > { %v282_v37 = vsel %vm281_vm9, %v279_v33, %v280_v34 }
  0x55   : > { %vm291_vm10 = vcmp.lt.s32.totalorder %v289_v35, %v290_v36  ;;  %v283_v38 = vrot.slane %v282_v37, 2 }
  0x56   : > { %v292_v39 = vsel %vm291_vm10, %v289_v35, %v290_v36 }
  0x57   : > { %v293_v40 = vrot.slane %v292_v39, 2  ;;  %vm284_vm11 = vcmp.lt.s32.totalorder %v282_v37, %v283_v38 }
  0x58   : > { %v285_v41 = vsel %vm284_vm11, %v282_v37, %v283_v38 }
  0x59   : > { %vm294_vm12 = vcmp.lt.s32.totalorder %v292_v39, %v293_v40  ;;  %v286_v42 = vrot.slane %v285_v41, 1 }
  0x5a   : > { %v295_v43 = vsel %vm294_vm12, %v292_v39, %v293_v40 }
  0x5b   : > { %v296_v44 = vrot.slane %v295_v43, 1  ;;  %vm287_vm13 = vcmp.lt.s32.totalorder %v285_v41, %v286_v42 }
  0x5c   : > { %v288_v45 = vsel %vm287_vm13, %v285_v41, %v286_v42 }
  0x5d   : > { %vm297_vm14 = vcmp.lt.s32.totalorder %v295_v43, %v296_v44  ;;  %vm299_vm15 = vcmp.eq.s32.totalorder %v891_v1, %v288_v45 }
  0x5e   : > { %v298_v46 = vsel %vm297_vm14, %v295_v43, %v296_v44  ;;  %vm523_vm1 = vmpackc.low %vm299_vm15, %vm299_vm15 }
  0x5f   : > { %vm300_vm0 = vcmp.eq.s32.totalorder %v891_v1, %v298_v46 }
  0x60   : > { %vm521_vm2 = vmpackc.low %vm300_vm0, %vm300_vm0 }
  0x61   : > { %522 = vmatprep.mubr.msk.bf16.mxu0 %vm521_vm2, %v750_v17 }
  0x62   : > { %524 = vmatmul.mubr.msk.bf16.vlgmr.msra.gmra.mxu0 %vm523_vm1, %v750_v17 }
 0x122   : > { %v360_v47 = vpop.f32.mrf.mxu0 }
 0x123   : > { %v531_v48 = vtrunc.f32 %v360_v47 }
 0x124   : > { %v362_v50 = vpop.f32.mrf.mxu0 }
 0x125   : > { %v532_v51 = vcvt.f32.s32 %v531_v48 }
 0x126   : > { %v363_v52 = vpop.f32.mrf.mxu0 }
 0x127   : > { %v368_v53 = vadd.s32 %v532_v51, %v366_v49 }
 0x128   : > { %v364_v54 = vpop.f32.mrf.mxu0 }
 0x129   : > { %370 = vst.msk [vmem:[%s893_s26] sm:$0xf] %vm369_vm3, %v368_v53 }
 0x12a   : > { %673 = shalt.err (!%p670_p6)
}
 0x12b   : > { %s674_s6 = scalar_lea.hbm %s919_s3, 128  ;;  %s678_s16 = scalar_lea.hbm %s964_s2, 256 }
 0x12c   : > { %p675_p7 = scmp.ne.s32.totalorder %s919_s3, %s674_s6  ;;  %p679_p4 = scmp.lt.s32.totalorder %s919_s3, %s964_s2 }
 0x12d   : > { %p680_p10 = scmp.lt.s32.totalorder %s678_s16, %s674_s6 }
 0x12e   : > { %p676_p1 = pnand %p675_p7, %p818_p9 }
 0x12f   : > { %p681_p8 = por %p680_p10, %p679_p4 }
 0x130   : > { %p677_p2 = pneg %p676_p1 }
 0x132   : > { %p682_p0 = pnand %p681_p8, %p677_p2 }
 0x134   : > { %685 = shalt.err (!%p682_p0)
}
 0x135   : > { %537 = dma.vmem_to_hbm [thread:$0]  (%p818_p9), %s387_s27, 128, %s919_s3, %s372_s7  }
 0x136 PF: > { %s398_s18 = sand.u32 1, %s724_s9   ;;  %p971_p3 = scmp.ge.s32.totalorder %s744_s14, 2 }
 0x137   : > { %s399_s20 = scalar_lea.sflag [#allocation4], %s398_s18 }
 0x138   : > { %p547_p13 = pnand %p971_p3, %p825_p11 }
 0x13a   : > { %p548_p5 = pneg %p547_p13 }
 0x13c   : > { %719 = dma.done.wait (%p548_p5), %s399_s20, 128  }
 0x13d   : > { %721 = vsyncadd (%p548_p5), %s399_s20, 4294967168  ;;  %s21_s14 = sadd.s32 1, %s744_s14   ;;  %s972_s9 = smov %s728_s10 }
 0x13e   : > { %p18_p12 = scmp.ge.s32.totalorder %s21_s14, 4   ;;  %s973_s10 = smov %s732_s11 }
 0x13f   : > { %s974_s11 = smov %s823_s23  ;;  %s975_s12 = smov %s740_s13 }
 0x140   : > { %s976_s13 = smov %s978_s17  ;;  %20 = sbr.rel (!%p18_p12) target bundleno = 8 (0x8), region = 90 }
 0x145   :  { %404 = vsyncpa [#allocation3], 1 }
 0x146   :  { %406 = vsyncpa [#allocation3 + $0x1], 1 }
 0x147   :  { %407 = vsyncpa [#allocation6], 1 }
 0x148   :  { %409 = vsyncpa [#allocation6 + $0x1], 1 }
 0x149   :  { %410 = vsyncpa [#allocation4], 1 }
 0x14a   :  { %412 = vsyncpa [#allocation4 + $0x1], 1 }

</bundles_post_ra>
